<compile_context>
chip_gen: v7x
topology: tpu7x:2x2x1
jax: 0.10.0
libtpu: 0.0.40
codegen_flags: <defaults>
</compile_context>

<pallas_src>
import functools
import math

import jax
import jax.numpy as jnp
from jax.experimental import pallas as pl
from jax.experimental.pallas import tpu as pltpu


NEG_INF = -1e30   # finite mask sentinel; self-loops guarantee no real row is fully masked
LANE = 128


def _round_up(x, m):
    return ((x + m - 1) // m) * m


def _choose_tiles(n):
    """Pick (dst_tile, src_tile, padded_n); tiles divide padded_n exactly.

    dst tile is pushed up to 512 (halves z/adj re-reads and per-step overhead vs
    256) but kept small enough that there are >= 2 dst blocks so v7x's two
    TensorCores both get work.  src tile <= 1024 keeps per-step VMEM (adj tile +
    f32 e/p temporaries + acc) comfortably inside v7x's 64 MiB physical VMEM.
    """
    if n <= 1024:
        n_pad = _round_up(n, LANE)
        tk = n_pad
    else:
        tk = 1024
        n_pad = _round_up(n, tk)
    tm = 128
    for cand in (512, 256):
        if n_pad % cand == 0 and n_pad // cand >= 2:
            tm = cand
            break
    return tm, tk, n_pad


def prepare_gat_graph(adj, n):
    """Pad + int8-cast adj[dst, src] and build the flat per-(dst-block, src-block)
    occupancy bitmap.  Hoist this out of the per-step path when the graph is
    static across layers / training steps (it is an O(N^2) XLA pass)."""
    tm, tk, n_pad = _choose_tiles(n)
    adj_i8 = jnp.pad((adj != 0).astype(jnp.int8), ((0, n_pad - n), (0, n_pad - n)))
    nd, ns = n_pad // tm, n_pad // tk
    bmap = jnp.any(adj_i8.reshape(nd, tm, ns, tk) != 0, axis=(1, 3))
    bmap = bmap.astype(jnp.int32).reshape(-1)      # flat 1D -> cheap SMEM layout
    return adj_i8, bmap, (tm, tk, n_pad)


# ---------------------------------------------------------------------------
# Kernel 1: projection  z = h @ W^T (MXU, bf16 in / f32 acc) and attention
# scores s_src = z . a_src, s_dst = z . a_dst via VPU multiply + lane reduce.
# ---------------------------------------------------------------------------
def _proj_kernel(h_ref, w_ref, a_src_ref, a_dst_ref, z_ref, s_src_ref, s_dst_ref):
    z = jnp.dot(h_ref[...], w_ref[...], preferred_element_type=jnp.float32)
    # lane reductions use the XLU slot; avoids a 2-column (lane-sparse) MXU pass
    s_src_ref[...] = jnp.sum(z * a_src_ref[...], axis=1, keepdims=True)
    s_dst_ref[...] = jnp.sum(z * a_dst_ref[...], axis=1, keepdims=True)
    z_ref[...] = z.astype(z_ref.dtype)             # bf16 copy fed to the attention matmul


# ---------------------------------------------------------------------------
# Kernel 2: masked-softmax aggregation with online softmax over src tiles.
# grid = (dst_blocks [parallel], src_blocks [arbitrary / reduction, last]).
# ---------------------------------------------------------------------------
def _attn_kernel(bmap_ref, s_dst_ref, s_src_ref, adj_ref, z_ref, out_ref,
                 m_sc, l_sc, acc_sc, *, tk, z_resident):
    di = pl.program_id(0)
    sj = pl.program_id(1)
    n_sj = pl.num_programs(1)

    @pl.when(sj == 0)
    def _():
        m_sc[...] = jnp.full_like(m_sc, NEG_INF)
        l_sc[...] = jnp.zeros_like(l_sc)
        acc_sc[...] = jnp.zeros_like(acc_sc)

    # Block-level sparsity skip: empty (dst-block, src-block) tiles pay nothing.
    @pl.when(bmap_ref[di * n_sj + sj] > 0)
    def _():
        # e[i, j] = leaky_relu(a_dst . z_i + a_src . z_j) for edge j -> i
        e = s_dst_ref[...] + s_src_ref[...]            # (TM,1) + (1,TK) -> (TM,TK)
        e = jnp.maximum(e, 0.01 * e)                   # leaky_relu (slope 0.01) as one max
        e = jnp.where(adj_ref[...] != 0, e, NEG_INF)   # mask straight off the int8 tile

        # online softmax update
        m_prev = m_sc[...]
        m_new = jnp.maximum(m_prev, jnp.max(e, axis=1, keepdims=True))
        corr = jnp.exp(m_prev - m_new)
        p = jnp.exp(e - m_new)                         # masked lanes underflow to 0
        l_sc[...] = corr * l_sc[...] + jnp.sum(p, axis=1, keepdims=True)

        if z_resident:
            start = pl.multiple_of(sj * tk, tk)        # slice the VMEM-resident z
            z_tile = z_ref[pl.ds(start, tk), :]
        else:
            z_tile = z_ref[...]
        acc_sc[...] = corr * acc_sc[...] + jnp.dot(
            p.astype(z_tile.dtype), z_tile, preferred_element_type=jnp.float32)
        m_sc[...] = m_new

    @pl.when(sj == n_sj - 1)
    def _():
        inv_l = pl.reciprocal(l_sc[...], approx=True)  # deferred normalization on the EUP
        out_ref[...] = (acc_sc[...] * inv_l).astype(out_ref.dtype)


def gat_layer_pallas(h, fc_weight, attn_weight, adj, graph=None):
    """h: (N, in_dim); fc_weight: (out_dim, in_dim); attn_weight: (1, 2*out_dim);
    adj: (N, N), adj[dst, src] != 0 for an edge src -> dst (any numeric dtype).
    `graph` may be a precomputed prepare_gat_graph(adj, N) result (static graphs)."""
    N, in_dim = h.shape
    out_dim = fc_weight.shape[0]
    out_pad = _round_up(out_dim, LANE)     # lane-dense z loads / acc / output stores

    if graph is None:
        adj_i8, bmap, (tm, tk, n_pad) = prepare_gat_graph(adj, N)
    else:
        adj_i8, bmap, (tm, tk, n_pad) = graph

    # bf16 operands for the projection matmul (MXU-native); zero-pad out_dim lanes.
    h_bf = jnp.pad(h, ((0, n_pad - N), (0, 0))).astype(jnp.bfloat16)
    w_bf = jnp.pad(fc_weight.astype(jnp.bfloat16).T, ((0, 0), (0, out_pad - out_dim)))
    a_src = jnp.pad(attn_weight[0, :out_dim].astype(jnp.float32),
                    (0, out_pad - out_dim)).reshape(1, out_pad)
    a_dst = jnp.pad(attn_weight[0, out_dim:].astype(jnp.float32),
                    (0, out_pad - out_dim)).reshape(1, out_pad)

    # ---- projection (z and scores computed once, not per attention tile) ----
    z_bf16, s_src_col, s_dst_col = pl.pallas_call(
        _proj_kernel,
        out_shape=(jax.ShapeDtypeStruct((n_pad, out_pad), jnp.bfloat16),
                   jax.ShapeDtypeStruct((n_pad, 1), jnp.float32),
                   jax.ShapeDtypeStruct((n_pad, 1), jnp.float32)),
        grid=(n_pad // tm,),
        in_specs=[
            pl.BlockSpec((tm, in_dim), lambda i: (i, 0)),
            pl.BlockSpec((in_dim, out_pad), lambda i: (0, 0)),
            pl.BlockSpec((1, out_pad), lambda i: (0, 0)),
            pl.BlockSpec((1, out_pad), lambda i: (0, 0)),
        ],
        out_specs=[
            pl.BlockSpec((tm, out_pad), lambda i: (i, 0)),
            pl.BlockSpec((tm, 1), lambda i: (i, 0)),
            pl.BlockSpec((tm, 1), lambda i: (i, 0)),
        ],
        compiler_params=pltpu.CompilerParams(dimension_semantics=("parallel",)),
    )(h_bf, w_bf, a_src, a_dst)

    s_src_row = s_src_col.reshape(1, n_pad)   # tiny XLA transpose: src scores as a lane row

    # ---- z residency + explicit scoped-VMEM budget (defaults: 16 MiB v5e,
    #      32 MiB v6e, 32-of-64 MiB v7x) ----
    z_bytes = n_pad * out_pad * 2
    z_resident = z_bytes <= (4 << 20)         # 2x (double buffer) still fits v7x headroom
    if z_resident:
        z_spec = pl.BlockSpec((n_pad, out_pad), lambda di, sj, bm: (0, 0))
    else:
        z_spec = pl.BlockSpec((tk, out_pad), lambda di, sj, bm: (sj, 0))

    est = (2 * tm * tk                                     # adj int8, double-buffered
           + (2 * z_bytes if z_resident else 4 * tk * out_pad * 2)
           + tm * out_pad * 4                              # f32 accumulator scratch
           + 2 * tm * out_pad * 4                          # output blocks
           + 6 * tm * tk * 4                               # f32 e/p temporaries headroom
           + (2 << 20))
    vmem_limit = int(min(max(est, 32 << 20), 48 << 20))    # stay under v7x's 64 MiB physical

    kernel = functools.partial(_attn_kernel, tk=tk, z_resident=z_resident)

    # ---- tiled attention aggregation ----
    out_padded = pl.pallas_call(
        kernel,
        out_shape=jax.ShapeDtypeStruct((n_pad, out_pad), jnp.float32),
        grid_spec=pltpu.PrefetchScalarGridSpec(
            num_scalar_prefetch=1,                         # block occupancy bitmap -> SMEM
            grid=(n_pad // tm, n_pad // tk),
            in_specs=[
                pl.BlockSpec((tm, 1), lambda di, sj, bm: (di, 0)),    # dst scores
                pl.BlockSpec((1, tk), lambda di, sj, bm: (0, sj)),    # src scores
                pl.BlockSpec((tm, tk), lambda di, sj, bm: (di, sj)),  # adjacency (int8)
                z_spec,                                               # z of src nodes (bf16)
            ],
            out_specs=pl.BlockSpec((tm, out_pad), lambda di, sj, bm: (di, 0)),
            scratch_shapes=[
                pltpu.VMEM((tm, 1), jnp.float32),          # running max
                pltpu.VMEM((tm, 1), jnp.float32),          # running sum
                pltpu.VMEM((tm, out_pad), jnp.float32),    # running weighted sum
            ],
        ),
        compiler_params=pltpu.CompilerParams(
            dimension_semantics=("parallel", "arbitrary"),
            vmem_limit_bytes=vmem_limit),
    )(bmap, s_dst_col, s_src_row, adj_i8, z_bf16)

    # Padded rows/cols produce garbage (or NaN for fully-skipped padded dst blocks);
    # always slice before use.
    return out_padded[:N, :out_dim]


def gat_layer_ref(h, fc_weight, attn_weight, adj):
    """Pure-JAX f32 reference (dense formulation of the DGL message passing)."""
    out_dim = fc_weight.shape[0]
    z = h @ fc_weight.T
    a_src = attn_weight[0, :out_dim]
    a_dst = attn_weight[0, out_dim:]
    e = (z @ a_dst)[:, None] + (z @ a_src)[None, :]      # e[i, j]: edge j -> i
    e = jnp.where(e >= 0.0, e, 0.01 * e)
    mask = adj != 0
    e = jnp.where(mask, e, -jnp.inf)
    alpha = jax.nn.softmax(e, axis=1)
    alpha = jnp.where(mask, alpha, 0.0)
    return alpha @ z


if __name__ == "__main__":
    key = jax.random.PRNGKey(0)
    k_h, k_fc, k_attn, k_adj = jax.random.split(key, 4)

    N, in_dim, out_dim = 64, 16, 32

    # Node features.
    h = jax.random.normal(k_h, (N, in_dim), dtype=jnp.float32)

    # Deterministic parameter init mirroring xavier_normal_ with gain('relu')=sqrt(2).
    gain = math.sqrt(2.0)
    std_fc = gain * math.sqrt(2.0 / (in_dim + out_dim))
    std_attn = gain * math.sqrt(2.0 / (2 * out_dim + 1))
    fc_weight = std_fc * jax.random.normal(k_fc, (out_dim, in_dim), dtype=jnp.float32)
    attn_weight = std_attn * jax.random.normal(k_attn, (1, 2 * out_dim), dtype=jnp.float32)

    # Deterministic random graph + self loops (required invariant); adj[dst, src], int8.
    adj = (jax.random.uniform(k_adj, (N, N)) < 0.2).astype(jnp.int8)
    adj = jnp.maximum(adj, jnp.eye(N, dtype=jnp.int8))

    out = jax.block_until_ready(gat_layer_pallas(h, fc_weight, attn_weight, adj))

    ref = gat_layer_ref(h, fc_weight, attn_weight, adj)
    assert out.shape == (N, out_dim)
    # bf16 MXU operands end-to-end (projection + attention) + approx reciprocal
    # => deliberately loosened tolerance vs the f32 reference.
    assert jnp.allclose(out, ref, rtol=4e-2, atol=4e-2), "Pallas output mismatch vs JAX reference"

    print("KERNEL_OK")
</pallas_src>

<mosaic_0001>
module attributes {stable_mosaic.version = 11 : i64} {
  func.func @_proj_kernel(%arg0: i32, %arg1: memref<128x16xbf16, #tpu.memory_space<vmem>>, %arg2: memref<16x128xbf16, #tpu.memory_space<vmem>>, %arg3: memref<1x128xf32, #tpu.memory_space<vmem>>, %arg4: memref<1x128xf32, #tpu.memory_space<vmem>>, %arg5: memref<128x128xbf16, #tpu.memory_space<vmem>>, %arg6: memref<128x1xf32, #tpu.memory_space<vmem>>, %arg7: memref<128x1xf32, #tpu.memory_space<vmem>>) attributes {dimension_semantics = [#tpu.dimension_semantics<parallel>], iteration_bounds = array<i64: 1>, scalar_prefetch = 0 : i64, scratch_operands = 0 : i64, tpu.core_type = #tpu.core_type<tc>, window_params = [{transform_indices = @transform_0, window_bounds = array<i64: 128, 16>}, {pipeline_mode = #tpu.pipeline_mode<synchronous>, transform_indices = @transform_1, window_bounds = array<i64: 16, 128>}, {pipeline_mode = #tpu.pipeline_mode<synchronous>, transform_indices = @transform_2, window_bounds = array<i64: 1, 128>}, {pipeline_mode = #tpu.pipeline_mode<synchronous>, transform_indices = @transform_3, window_bounds = array<i64: 1, 128>}, {transform_indices = @transform_4, window_bounds = array<i64: 128, 128>}, {transform_indices = @transform_5, window_bounds = array<i64: 128, 1>}, {transform_indices = @transform_6, window_bounds = array<i64: 128, 1>}]} {
    %c0 = arith.constant 0 : index
    %c0_0 = arith.constant 0 : index
    %0 = vector.load %arg1[%c0, %c0_0] : memref<128x16xbf16, #tpu.memory_space<vmem>>, vector<128x16xbf16>
    %c0_1 = arith.constant 0 : index
    %c0_2 = arith.constant 0 : index
    %1 = vector.load %arg2[%c0_1, %c0_2] : memref<16x128xbf16, #tpu.memory_space<vmem>>, vector<16x128xbf16>
    %cst = arith.constant dense<0.000000e+00> : vector<128x128xf32>
    %2 = tpu.matmul %0, %1, %cst {dimension_numbers = #tpu.dot_dimension_numbers<[1], [0], [0], [1], [0, 0, 1, 1], [], []>} : vector<128x16xbf16>, vector<16x128xbf16>, vector<128x128xf32> -> vector<128x128xf32>
    %c0_3 = arith.constant 0 : index
    %c0_4 = arith.constant 0 : index
    %3 = vector.load %arg3[%c0_3, %c0_4] : memref<1x128xf32, #tpu.memory_space<vmem>>, vector<1x128xf32>
    %4 = vector.broadcast %3 : vector<1x128xf32> to vector<128x128xf32>
    %5 = arith.mulf %2, %4 : vector<128x128xf32>
    %cst_5 = arith.constant dense<0.000000e+00> : vector<128xf32>
    %6 = vector.multi_reduction <add>, %5, %cst_5 [1] : vector<128x128xf32> to vector<128xf32>
    %7 = vector.shape_cast %6 : vector<128xf32> to vector<128x1xf32>
    %c0_6 = arith.constant 0 : index
    %c0_7 = arith.constant 0 : index
    %8 = vector.load %arg6[%c0_6, %c0_7] : memref<128x1xf32, #tpu.memory_space<vmem>>, vector<128x1xf32>
    tpu.vector_store %arg6[%c0_6, %c0_7], %7 {strides = array<i32>} : memref<128x1xf32, #tpu.memory_space<vmem>>, vector<128x1xf32>,
    %c0_8 = arith.constant 0 : index
    %c0_9 = arith.constant 0 : index
    %9 = vector.load %arg4[%c0_8, %c0_9] : memref<1x128xf32, #tpu.memory_space<vmem>>, vector<1x128xf32>
    %10 = vector.broadcast %9 : vector<1x128xf32> to vector<128x128xf32>
    %11 = arith.mulf %2, %10 : vector<128x128xf32>
    %cst_10 = arith.constant dense<0.000000e+00> : vector<128xf32>
    %12 = vector.multi_reduction <add>, %11, %cst_10 [1] : vector<128x128xf32> to vector<128xf32>
    %13 = vector.shape_cast %12 : vector<128xf32> to vector<128x1xf32>
    %c0_11 = arith.constant 0 : index
    %c0_12 = arith.constant 0 : index
    %14 = vector.load %arg7[%c0_11, %c0_12] : memref<128x1xf32, #tpu.memory_space<vmem>>, vector<128x1xf32>
    tpu.vector_store %arg7[%c0_11, %c0_12], %13 {strides = array<i32>} : memref<128x1xf32, #tpu.memory_space<vmem>>, vector<128x1xf32>,
    %15 = arith.truncf %2 : vector<128x128xf32> to vector<128x128xbf16>
    %c0_13 = arith.constant 0 : index
    %c0_14 = arith.constant 0 : index
    %16 = vector.load %arg5[%c0_13, %c0_14] : memref<128x128xbf16, #tpu.memory_space<vmem>>, vector<128x128xbf16>
    tpu.vector_store %arg5[%c0_13, %c0_14], %15 {strides = array<i32>} : memref<128x128xbf16, #tpu.memory_space<vmem>>, vector<128x128xbf16>,
    return
  }
  func.func @transform_0(%arg0: i32) -> (i32, i32) {
    %c0_i32 = arith.constant 0 : i32
    %c0_i32_0 = arith.constant 0 : i32
    return %arg0, %c0_i32 : i32, i32
  }
  func.func @transform_1(%arg0: i32) -> (i32, i32) {
    %c0_i32 = arith.constant 0 : i32
    %c0_i32_0 = arith.constant 0 : i32
    %c0_i32_1 = arith.constant 0 : i32
    return %c0_i32, %c0_i32_0 : i32, i32
  }
  func.func @transform_2(%arg0: i32) -> (i32, i32) {
    %c0_i32 = arith.constant 0 : i32
    %c0_i32_0 = arith.constant 0 : i32
    %c0_i32_1 = arith.constant 0 : i32
    return %c0_i32, %c0_i32_0 : i32, i32
  }
  func.func @transform_3(%arg0: i32) -> (i32, i32) {
    %c0_i32 = arith.constant 0 : i32
    %c0_i32_0 = arith.constant 0 : i32
    %c0_i32_1 = arith.constant 0 : i32
    return %c0_i32, %c0_i32_0 : i32, i32
  }
  func.func @transform_4(%arg0: i32) -> (i32, i32) {
    %c0_i32 = arith.constant 0 : i32
    %c0_i32_0 = arith.constant 0 : i32
    return %arg0, %c0_i32 : i32, i32
  }
  func.func @transform_5(%arg0: i32) -> (i32, i32) {
    %c0_i32 = arith.constant 0 : i32
    %c0_i32_0 = arith.constant 0 : i32
    return %arg0, %c0_i32 : i32, i32
  }
  func.func @transform_6(%arg0: i32) -> (i32, i32) {
    %c0_i32 = arith.constant 0 : i32
    %c0_i32_0 = arith.constant 0 : i32
    return %arg0, %c0_i32 : i32, i32
  }
}

</mosaic_0001>

<bundles_post_ra>
// kernel: tpu_custom_call.1
= control target key start
LH: loop header
LB: loop body
LE: loop exit
PB: predicated region body
PF: predicated region fallthrough
CT: control target
= control target key end

     0   :  { %vm86_vm0 = vcmask 130048   ;;  %s878_s0 = inlined_call_operand.vmem [shape: bf16[128,16], index: 0, kind: input, shape index: {}]   ;;  %s879_s1 = inlined_call_operand.vmem [shape: bf16[16,128], index: 1, kind: input, shape index: {}]   ;;  %s880_s2 = inlined_call_operand.vmem [shape: f32[1,128], index: 2, kind: input, shape index: {}]   ;;  %s881_s3 = inlined_call_operand.vmem [shape: f32[1,128], index: 3, kind: input, shape index: {}]   ;;  %s882_s4 = inlined_call_operand.hbm [shape: bf16[128,128], index: 4, kind: output, shape index: {0}]   ;;  %s883_s5 = inlined_call_operand.vmem [shape: f32[128,1], index: 5, kind: output, shape index: {1}]   ;;  %s884_s6 = inlined_call_operand.vmem [shape: f32[128,1], index: 6, kind: output, shape index: {2}]  }
   0x1   :  { %v585_v0 = vld [vmem:[%s879_s1] sm:$0xff]   ;;  %v588_v3 = vld [vmem:[%s878_s0 + $0x8] sm:$0xff]   ;;  %v590_v5 = vld [vmem:[%s878_s0 + $0x10] sm:$0xff]  }
   0x2   :  { %v586_v1 = vld [vmem:[%s878_s0] sm:$0xff]   ;;  %562 = vmatprep.subr.bf16.mxu0 %v585_v0  ;;  %580 = vmatprep.subr.bf16.mxu1 %v585_v0  ;;  %v589_v4 = vld [vmem:[%s878_s0 + $0x28] sm:$0xff]   ;;  %v592_v6 = vld [vmem:[%s878_s0 + $0x30] sm:$0xff]  }
   0x3   :  { %v587_v2 = vld [vmem:[%s878_s0 + $0x20] sm:$0xff]   ;;  %563 = vmatpush3.bf16.msra.mxu0 %v585_v0  ;;  %581 = vmatpush3.bf16.msra.mxu1 %v585_v0 }
   0x4   :  { %564 = vmatprep.mubr.msk.bf16.mxu0 %vm86_vm0, %v586_v1  ;;  %572 = vmatprep.mubr.msk.bf16.mxu1 %vm86_vm0, %v587_v2 }
   0x6   :  { %565 = vmatmul.mubr.msk.bf16.vlgmr.msra.gmra.mrb[0].mxu0 %vm86_vm0, %v588_v3  ;;  %573 = vmatmul.mubr.msk.bf16.vlgmr.msra.gmra.mrb[0].mxu1 %vm86_vm0, %v589_v4 }
   0x7   :  { %568 = vmatprep.mubr.msk.bf16.mxu0 %vm86_vm0, %v590_v5  ;;  %576 = vmatprep.mubr.msk.bf16.mxu1 %vm86_vm0, %v592_v6 }
   0x8   :  { %12 = vsyncpa [#allocation3], 0  ;;  %v591_v7 = vld [vmem:[%s878_s0 + $0x18] sm:$0xff]   ;;  %v694_v9 = vld [vmem:[%s880_s2] ss:$0 sm:$0xff]  ;;  %s618_s2 = smov [#allocation2]  }
   0x9   :  { %v593_v8 = vld [vmem:[%s878_s0 + $0x38] sm:$0xff]   ;;  %v701_v18 = vld [vmem:[%s881_s3] ss:$0 sm:$0xff]  ;;  %s436_s3 = sshll.u32 %s618_s2, 4  ;;  %s437_s3 = int_to_ptr.vmem [resolvable:$true] %s436_s3 }
   0xa   :  { %s594_s17 = scalar_lea.vmem %s437_s3, 1024  ;;  %p599_p1 = scmp.lt.s32.totalorder %s437_s3, %s437_s3 }
   0xb   :  { %p595_p0 = scmp.ne.s32.totalorder %s437_s3, %s594_s17  ;;  %p600_p2 = scmp.lt.s32.totalorder %s594_s17, %s594_s17 }
   0xd   :  { %p601_p3 = por %p600_p2, %p599_p1 }
   0xe   :  { %569 = vmatmul.mubr.msk.bf16.gmra.mrb[4].mxu0 %vm86_vm0, %v591_v7  ;;  %577 = vmatmul.mubr.msk.bf16.gmra.mrb[4].mxu1 %vm86_vm0, %v593_v8 }
   0xf   :  { %p602_p4 = pnand %p601_p3, %p595_p0 }
  0xd9   :  { %v566_v10 = vpop.f32.mrb[0].mxu0  ;;  %v574_v11 = vpop.f32.mrb[0].mxu1 }
  0xda   :  { %v145_v12 = vpop.f32.mrb[1].mxu0  ;;  %v177_v13 = vpop.f32.mrb[1].mxu1  ;;  %v225_v14 = vmul.f32 %v574_v11, %v694_v9  ;;  %v217_v15 = vmul.f32 %v566_v10, %v694_v9  ;;  %v289_v25 = vmul.f32 %v566_v10, %v701_v18  ;;  %v297_v29 = vmul.f32 %v574_v11, %v701_v18 }
  0xdb   :  { %v567_v16 = vpop.f32.mrb[2].mxu0  ;;  %v575_v17 = vpop.f32.mrb[2].mxu1  ;;  %v215_v41 = vmul.f32 %v694_v9, %v145_v12  ;;  %v223_v43 = vmul.f32 %v694_v9, %v177_v13  ;;  %v287_v45 = vmul.f32 %v701_v18, %v145_v12  ;;  %v295_v47 = vmul.f32 %v701_v18, %v177_v13 }
  0xdc   :  { %v514_v19 = vpack.c.bf16 %v567_v16, %v566_v10  ;;  %v534_v20 = vpack.c.bf16 %v575_v17, %v574_v11  ;;  %251 = vadd.xlane.f32.xlu0 %v225_v14  ;;  %v180_v21 = vpop.f32.mrb[3].mxu1  ;;  %235 = vadd.xlane.f32.xlu1 %v217_v15  ;;  %v148_v22 = vpop.f32.mrb[3].mxu0  ;;  %v218_v26 = vmul.f32 %v567_v16, %v694_v9 }
  0xdd   :  { %v529_v23 = vpack.c.bf16 %v180_v21, %v177_v13  ;;  %v509_v24 = vpack.c.bf16 %v148_v22, %v145_v12  ;;  %v226_v30 = vmul.f32 %v575_v17, %v694_v9  ;;  %v290_v42 = vmul.f32 %v567_v16, %v701_v18 }
  0xde   :  { %546 = vst [vmem:[#allocation2 + $0x8] sm:$0xff] %v514_v19   ;;  %550 = vst [vmem:[#allocation2 + $0x28] sm:$0xff] %v534_v20   ;;  %v298_v44 = vmul.f32 %v575_v17, %v701_v18  ;;  %v224_v46 = vmul.f32 %v694_v9, %v180_v21  ;;  %v288_v48 = vmul.f32 %v701_v18, %v148_v22 }
  0xdf   :  { %549 = vst [vmem:[#allocation2 + $0x20] sm:$0xff] %v529_v23   ;;  %510 = vst [vmem:[#allocation2] sm:$0xff] %v509_v24   ;;  %v296_v49 = vmul.f32 %v701_v18, %v180_v21  ;;  %v216_v50 = vmul.f32 %v694_v9, %v148_v22 }
  0xe0   :  { %307 = vadd.xlane.f32.xlu0 %v289_v25  ;;  %237 = vadd.xlane.f32.xlu1 %v218_v26 }
  0xe1   :  { %v570_v27 = vpop.f32.mrb[4].mxu0  ;;  %v705_v28 = vpop.f32.mrb[4].mxu1 }
  0xe2   :  { %v161_v31 = vpop.f32.mrb[5].mxu0  ;;  %v193_v32 = vpop.f32.mrb[5].mxu1  ;;  %v221_v51 = vmul.f32 %v570_v27, %v694_v9  ;;  %v229_v53 = vmul.f32 %v705_v28, %v694_v9  ;;  %v293_v55 = vmul.f32 %v570_v27, %v701_v18  ;;  %v301_v1 = vmul.f32 %v705_v28, %v701_v18 }
  0xe3   :  { %v571_v33 = vpop.f32.mrb[6].mxu0  ;;  %v579_v34 = vpop.f32.mrb[6].mxu1  ;;  %v219_v57 = vmul.f32 %v694_v9, %v161_v31  ;;  %v227_v59 = vmul.f32 %v694_v9, %v193_v32  ;;  %v291_v61 = vmul.f32 %v701_v18, %v161_v31  ;;  %v299_v63 = vmul.f32 %v701_v18, %v193_v32 }
  0xe4   :  { %323 = vadd.xlane.f32.xlu0 %v297_v29  ;;  %253 = vadd.xlane.f32.xlu1 %v226_v30  ;;  %v524_v35 = vpack.c.bf16 %v571_v33, %v570_v27  ;;  %v164_v36 = vpop.f32.mrb[7].mxu0  ;;  %v544_v37 = vpack.c.bf16 %v579_v34, %v705_v28  ;;  %v196_v38 = vpop.f32.mrb[7].mxu1  ;;  %v222_v52 = vmul.f32 %v571_v33, %v694_v9 }
  0xe5   :  { %v519_v39 = vpack.c.bf16 %v164_v36, %v161_v31  ;;  %v539_v40 = vpack.c.bf16 %v196_v38, %v193_v32  ;;  %v230_v54 = vmul.f32 %v579_v34, %v694_v9  ;;  %v294_v56 = vmul.f32 %v571_v33, %v701_v18 }
  0xe6   :  { %548 = vst [vmem:[#allocation2 + $0x18] sm:$0xff] %v524_v35   ;;  %552 = vst [vmem:[#allocation2 + $0x38] sm:$0xff] %v544_v37   ;;  %v220_v58 = vmul.f32 %v694_v9, %v164_v36  ;;  %v228_v60 = vmul.f32 %v694_v9, %v196_v38  ;;  %v292_v62 = vmul.f32 %v701_v18, %v164_v36 }
  0xe7   :  { %547 = vst [vmem:[#allocation2 + $0x10] sm:$0xff] %v519_v39   ;;  %551 = vst [vmem:[#allocation2 + $0x30] sm:$0xff] %v539_v40   ;;  %v300_v0 = vmul.f32 %v701_v18, %v196_v38  ;;  %v302_v2 = vmul.f32 %v579_v34, %v701_v18 }
  0xe8   :  { %231 = vadd.xlane.f32.xlu0 %v215_v41  ;;  %309 = vadd.xlane.f32.xlu1 %v290_v42 }
  0xec   :  { %247 = vadd.xlane.f32.xlu0 %v223_v43  ;;  %325 = vadd.xlane.f32.xlu1 %v298_v44 }
  0xf0   :  { %303 = vadd.xlane.f32.xlu0 %v287_v45  ;;  %249 = vadd.xlane.f32.xlu1 %v224_v46 }
  0xf4   :  { %319 = vadd.xlane.f32.xlu0 %v295_v47  ;;  %305 = vadd.xlane.f32.xlu1 %v288_v48 }
  0xf8   :  { %321 = vadd.xlane.f32.xlu1 %v296_v49  ;;  %233 = vadd.xlane.f32.xlu0 %v216_v50 }
  0xfc   :  { %243 = vadd.xlane.f32.xlu0 %v221_v51  ;;  %245 = vadd.xlane.f32.xlu1 %v222_v52 }
 0x100   :  { %259 = vadd.xlane.f32.xlu0 %v229_v53  ;;  %261 = vadd.xlane.f32.xlu1 %v230_v54 }
 0x104   :  { %315 = vadd.xlane.f32.xlu0 %v293_v55  ;;  %317 = vadd.xlane.f32.xlu1 %v294_v56 }
 0x108   :  { %239 = vadd.xlane.f32.xlu0 %v219_v57  ;;  %241 = vadd.xlane.f32.xlu1 %v220_v58 }
 0x10c   :  { %255 = vadd.xlane.f32.xlu0 %v227_v59  ;;  %257 = vadd.xlane.f32.xlu1 %v228_v60 }
 0x110   :  { %311 = vadd.xlane.f32.xlu0 %v291_v61  ;;  %313 = vadd.xlane.f32.xlu1 %v292_v62 }
 0x114   :  { %327 = vadd.xlane.f32.xlu0 %v299_v63  ;;  %329 = vadd.xlane.f32.xlu1 %v300_v0 }
 0x118   :  { %331 = vadd.xlane.f32.xlu0 %v301_v1  ;;  %333 = vadd.xlane.f32.xlu1 %v302_v2 }
 0x119   :  { %605 = shalt.err (!%p602_p4)
}
 0x11a   :  { %s606_s20 = scalar_lea.hbm %s882_s4, 1024 }
 0x11b   :  { %p607_p5 = scmp.ne.s32.totalorder %s882_s4, %s606_s20  ;;  %p610_p6 = scmp.lt.u32.totalorder %s606_s20, %s882_s4 }
 0x11d   :  { %p612_p7 = pnand %p610_p6, %p607_p5 }
 0x11f   :  { %615 = shalt.err (!%p612_p7)
}
 0x120   :  { %s619_s25 = smov 64   ;;  %s620_s26 = smov 4   ;;  %vm263_vm1 = vcmask 7168  }
 0x121   :  { %442 = dma.vmem_to_hbm [thread:$0]  %s437_s3, 1024, %s882_s4, [#allocation3], %s619_s25, %s619_s25, %s620_s26  }
 0x169   :  { %v252_v3 = vpop.xlane.xlu0 %251  ;;  %v236_v4 = vpop.xlane.xlu1 %235 }
 0x16a   :  { %274 = vst.msk [vmem:[%s883_s5 + $0x50] sm:$0xff] %vm263_vm1, %v252_v3  ;;  %266 = vst.msk [vmem:[%s883_s5 + $0x10] sm:$0xff] %vm263_vm1, %v236_v4 }
 0x16d   :  { %v308_v5 = vpop.xlane.xlu0 %307  ;;  %v238_v6 = vpop.xlane.xlu1 %237 }
 0x16e   :  { %337 = vst.msk [vmem:[%s884_s6 + $0x10] sm:$0xff] %vm263_vm1, %v308_v5  ;;  %267 = vst.msk [vmem:[%s883_s5 + $0x18] sm:$0xff] %vm263_vm1, %v238_v6 }
 0x171   :  { %v324_v7 = vpop.xlane.xlu0 %323  ;;  %v254_v8 = vpop.xlane.xlu1 %253 }
 0x172   :  { %345 = vst.msk [vmem:[%s884_s6 + $0x50] sm:$0xff] %vm263_vm1, %v324_v7  ;;  %275 = vst.msk [vmem:[%s883_s5 + $0x58] sm:$0xff] %vm263_vm1, %v254_v8 }
 0x175   :  { %v232_v9 = vpop.xlane.xlu0 %231  ;;  %v310_v10 = vpop.xlane.xlu1 %309 }
 0x176   :  { %264 = vst.msk [vmem:[%s883_s5] sm:$0xff] %vm263_vm1, %v232_v9  ;;  %338 = vst.msk [vmem:[%s884_s6 + $0x18] sm:$0xff] %vm263_vm1, %v310_v10 }
 0x179   :  { %v248_v11 = vpop.xlane.xlu0 %247  ;;  %v326_v12 = vpop.xlane.xlu1 %325 }
 0x17a   :  { %272 = vst.msk [vmem:[%s883_s5 + $0x40] sm:$0xff] %vm263_vm1, %v248_v11  ;;  %346 = vst.msk [vmem:[%s884_s6 + $0x58] sm:$0xff] %vm263_vm1, %v326_v12 }
 0x17d   :  { %v304_v13 = vpop.xlane.xlu0 %303  ;;  %v250_v14 = vpop.xlane.xlu1 %249 }
 0x17e   :  { %335 = vst.msk [vmem:[%s884_s6] sm:$0xff] %vm263_vm1, %v304_v13  ;;  %273 = vst.msk [vmem:[%s883_s5 + $0x48] sm:$0xff] %vm263_vm1, %v250_v14 }
 0x181   :  { %v320_v15 = vpop.xlane.xlu0 %319  ;;  %v306_v16 = vpop.xlane.xlu1 %305 }
 0x182   :  { %343 = vst.msk [vmem:[%s884_s6 + $0x40] sm:$0xff] %vm263_vm1, %v320_v15  ;;  %336 = vst.msk [vmem:[%s884_s6 + $0x8] sm:$0xff] %vm263_vm1, %v306_v16 }
 0x185   :  { %v322_v17 = vpop.xlane.xlu1 %321  ;;  %v234_v18 = vpop.xlane.xlu0 %233 }
 0x186   :  { %344 = vst.msk [vmem:[%s884_s6 + $0x48] sm:$0xff] %vm263_vm1, %v322_v17  ;;  %265 = vst.msk [vmem:[%s883_s5 + $0x8] sm:$0xff] %vm263_vm1, %v234_v18 }
 0x189   :  { %v244_v19 = vpop.xlane.xlu0 %243  ;;  %v246_v20 = vpop.xlane.xlu1 %245 }
 0x18a   :  { %270 = vst.msk [vmem:[%s883_s5 + $0x30] sm:$0xff] %vm263_vm1, %v244_v19  ;;  %271 = vst.msk [vmem:[%s883_s5 + $0x38] sm:$0xff] %vm263_vm1, %v246_v20 }
 0x18d   :  { %v260_v21 = vpop.xlane.xlu0 %259  ;;  %v262_v22 = vpop.xlane.xlu1 %261 }
 0x18e   :  { %278 = vst.msk [vmem:[%s883_s5 + $0x70] sm:$0xff] %vm263_vm1, %v260_v21  ;;  %279 = vst.msk [vmem:[%s883_s5 + $0x78] sm:$0xff] %vm263_vm1, %v262_v22 }
 0x191   :  { %v316_v23 = vpop.xlane.xlu0 %315  ;;  %v318_v24 = vpop.xlane.xlu1 %317 }
 0x192   :  { %341 = vst.msk [vmem:[%s884_s6 + $0x30] sm:$0xff] %vm263_vm1, %v316_v23  ;;  %342 = vst.msk [vmem:[%s884_s6 + $0x38] sm:$0xff] %vm263_vm1, %v318_v24 }
 0x195   :  { %v240_v25 = vpop.xlane.xlu0 %239  ;;  %v242_v26 = vpop.xlane.xlu1 %241 }
 0x196   :  { %268 = vst.msk [vmem:[%s883_s5 + $0x20] sm:$0xff] %vm263_vm1, %v240_v25  ;;  %269 = vst.msk [vmem:[%s883_s5 + $0x28] sm:$0xff] %vm263_vm1, %v242_v26 }
 0x199   :  { %v256_v27 = vpop.xlane.xlu0 %255  ;;  %v258_v28 = vpop.xlane.xlu1 %257 }
 0x19a   :  { %276 = vst.msk [vmem:[%s883_s5 + $0x60] sm:$0xff] %vm263_vm1, %v256_v27  ;;  %277 = vst.msk [vmem:[%s883_s5 + $0x68] sm:$0xff] %vm263_vm1, %v258_v28 }
 0x19d   :  { %v312_v29 = vpop.xlane.xlu0 %311  ;;  %v314_v30 = vpop.xlane.xlu1 %313 }
 0x19e   :  { %339 = vst.msk [vmem:[%s884_s6 + $0x20] sm:$0xff] %vm263_vm1, %v312_v29  ;;  %340 = vst.msk [vmem:[%s884_s6 + $0x28] sm:$0xff] %vm263_vm1, %v314_v30 }
 0x1a1   :  { %v328_v31 = vpop.xlane.xlu0 %327  ;;  %v330_v32 = vpop.xlane.xlu1 %329 }
 0x1a2   :  { %347 = vst.msk [vmem:[%s884_s6 + $0x60] sm:$0xff] %vm263_vm1, %v328_v31  ;;  %348 = vst.msk [vmem:[%s884_s6 + $0x68] sm:$0xff] %vm263_vm1, %v330_v32 }
 0x1a5   :  { %v332_v33 = vpop.xlane.xlu0 %331  ;;  %v334_v34 = vpop.xlane.xlu1 %333 }
 0x1a6   :  { %349 = vst.msk [vmem:[%s884_s6 + $0x70] sm:$0xff] %vm263_vm1, %v332_v33  ;;  %350 = vst.msk [vmem:[%s884_s6 + $0x78] sm:$0xff] %vm263_vm1, %v334_v34 }
 0x1a7   :  { %616 = dma.done.wait [#allocation3], 1024  }
 0x1a8   :  { %617 = vsyncadd [#allocation3], 4294966272 }
 0x1a9   :  { %454 = vsyncpa [#allocation3], 1 }

</bundles_post_ra>
